<compile_context>
chip_gen: v7x
topology: tpu7x:2x2x1
jax: 0.10.0
libtpu: 0.0.40
codegen_flags: <defaults>
</compile_context>

<pallas_src>
import functools

import jax
import jax.numpy as jnp
from jax.experimental import pallas as pl
from jax.experimental.pallas import tpu as pltpu

_LANE = 128


def _tpu_generation() -> int:
    """Best-effort TPU generation (5 / 6 / 7); 0 if unknown."""
    try:
        kind = jax.devices()[0].device_kind.lower()
    except Exception:
        return 0
    for g in (7, 6, 5, 4):
        if f"v{g}" in kind:
            return g
    return 0


def _block_config(gen: int):
    """Return (target block bytes, vmem_limit_bytes or None) per generation."""
    if gen >= 7:
        # 3.2 TB/s HBM: 2 MiB blocks lose ~20% to the ~0.35 us/step overhead.
        # 6 MiB blocks -> ~4 pipelined buffers * 6 MiB = 24 MiB VMEM; raise the
        # scoped limit explicitly (32 MiB default, 64 MiB physical on v7x).
        return 6 * 1024 * 1024, 48 * 1024 * 1024
    if gen == 6:
        # 32 MiB scoped default / 128 MiB physical: 6 MiB blocks fit easily.
        return 6 * 1024 * 1024, 64 * 1024 * 1024
    # v5e (and unknown -> conservative): ~820 GB/s HBM, 16 MiB scoped default.
    # 3 MiB blocks -> 12 MiB pipelined VMEM, already ~93% of roofline.
    return 3 * 1024 * 1024, None


def _sublane_min(dtype) -> int:
    itemsize = jnp.dtype(dtype).itemsize
    if itemsize >= 4:
        return 8
    if itemsize == 2:
        return 16
    return 32  # int8 / fp8


def _compute_dtype(dtype, gen: int):
    # v6e/v7x have bf16-capable VPU/EUP: bf16 compute halves per-element EUP
    # and VALU work (protects the single EUP slot at v7x bandwidth) and halves
    # vreg pressure.  v5e has no bf16 VPU/EUP -> keep f32 compute there.
    if jnp.dtype(dtype) == jnp.bfloat16 and gen >= 6:
        return jnp.bfloat16
    return jnp.float32


def _swish_kernel(x_ref, o_ref, *, compute_dtype):
    x = x_ref[...].astype(compute_dtype)
    # Keep jax.nn.sigmoid: single transcendental per element on the EUP.
    o_ref[...] = (x * jax.nn.sigmoid(x)).astype(o_ref.dtype)


def _swish_slab(x2d, *, gen: int, donate_input: bool):
    """Run the Pallas kernel on a lane-dense [rows, 128] slab."""
    rows = x2d.shape[0]
    dtype = x2d.dtype
    itemsize = jnp.dtype(dtype).itemsize
    sub_min = _sublane_min(dtype)
    block_bytes, vmem_limit = _block_config(gen)

    # Row tile: target the per-generation block size, aligned to the dtype's
    # sublane minimum.  cdiv grid -> a non-divisible `rows` yields one partial
    # edge block (OOB writes dropped) instead of shrinking tr.
    target_tr = max(block_bytes // (_LANE * itemsize), sub_min)
    target_tr = (target_tr // sub_min) * sub_min
    rows_rounded = pl.cdiv(rows, sub_min) * sub_min
    tr = max(min(target_tr, rows_rounded), sub_min)
    grid = (pl.cdiv(rows, tr),)

    n_elems = rows * _LANE
    cost = pl.CostEstimate(
        flops=4 * n_elems,
        transcendentals=n_elems,
        bytes_accessed=2 * n_elems * itemsize,
    )

    kernel = functools.partial(
        _swish_kernel, compute_dtype=_compute_dtype(dtype, gen))

    extra = {}
    if donate_input:
        # Reuse the input HBM buffer for the output (caller must donate x);
        # avoids a second N-byte HBM allocation for large activations.
        extra["input_output_aliases"] = {0: 0}

    return pl.pallas_call(
        kernel,
        out_shape=jax.ShapeDtypeStruct((rows, _LANE), dtype),
        grid_spec=pltpu.PrefetchScalarGridSpec(
            num_scalar_prefetch=0,
            grid=grid,
            in_specs=[pl.BlockSpec((tr, _LANE), lambda i: (i, 0))],
            out_specs=pl.BlockSpec((tr, _LANE), lambda i: (i, 0)),
        ),
        compiler_params=pltpu.CompilerParams(
            # TODO(synk): verify in a v7x trace that "parallel" shards the grid
            # across both TensorCores; switch to pltpu.CORE_PARALLEL if not.
            dimension_semantics=("parallel",),
            vmem_limit_bytes=vmem_limit,
        ),
        cost_estimate=cost,
        **extra,
    )(x2d)


def swish(x, *, donate_input: bool = False):
    """Elementwise Swish: x * sigmoid(x).  Works for any shape/dtype."""
    orig_shape = x.shape
    dtype = x.dtype
    n = x.size
    if n == 0:
        return x

    gen = _tpu_generation()
    x_flat = jnp.ravel(x)
    n_main = (n // _LANE) * _LANE

    def _tail_swish(t):
        tf = t.astype(_compute_dtype(dtype, gen))
        return (tf * jax.nn.sigmoid(tf)).astype(dtype)

    if n_main == 0:
        # Entire array smaller than one lane row: plain jnp is optimal.
        return _tail_swish(x_flat).reshape(orig_shape)

    if n_main == n:
        # 128-aligned: zero-copy reshape, no extra HBM traffic.
        x2d = x_flat.reshape(n // _LANE, _LANE)
        out2d = _swish_slab(x2d, gen=gen, donate_input=donate_input)
        return out2d.reshape(orig_shape)

    # Lane-unaligned: kernel on the 128-aligned prefix, <128-element tail in
    # plain jnp.  Avoids the full-array jnp.pad + out[:n] round-trips that
    # would double-to-triple HBM traffic on unaligned shapes.
    # TODO(synk): with a donated output buffer the final concat could become an
    # in-place dynamic_update_slice to drop the stitch copy as well.
    main = x_flat[:n_main].reshape(n_main // _LANE, _LANE)
    out_main = _swish_slab(main, gen=gen, donate_input=donate_input)
    out_tail = _tail_swish(x_flat[n_main:])
    out_flat = jnp.concatenate([out_main.reshape(-1), out_tail])
    return out_flat.reshape(orig_shape)


if __name__ == "__main__":
    key = jax.random.PRNGKey(0)

    # NCHW input, consistent with the PyTorch conv convention (lane-aligned).
    x = jax.random.normal(key, (2, 4, 16, 16), dtype=jnp.float32)
    y = swish(x)
    jax.block_until_ready(y)
    y_ref = x * jax.nn.sigmoid(x)
    assert y.shape == x.shape and y.dtype == x.dtype
    assert jnp.max(jnp.abs(y - y_ref)) < 1e-5

    # bf16, flat size < 128 (pure tail path; exercises bf16 compute on v6/v7).
    xb = jax.random.normal(jax.random.PRNGKey(1), (3, 5, 7), dtype=jnp.bfloat16)
    yb = swish(xb)
    jax.block_until_ready(yb)
    yb_ref = (xb.astype(jnp.float32) * jax.nn.sigmoid(xb.astype(jnp.float32))
              ).astype(jnp.bfloat16)
    assert yb.shape == xb.shape and yb.dtype == xb.dtype
    assert jnp.max(jnp.abs(yb.astype(jnp.float32)
                           - yb_ref.astype(jnp.float32))) < 1e-2

    # f32, lane-unaligned flat size > 128 (kernel on aligned prefix + tail).
    xu = jax.random.normal(jax.random.PRNGKey(2), (5, 77), dtype=jnp.float32)
    yu = swish(xu)
    jax.block_until_ready(yu)
    yu_ref = xu * jax.nn.sigmoid(xu)
    assert yu.shape == xu.shape and yu.dtype == xu.dtype
    assert jnp.max(jnp.abs(yu - yu_ref)) < 1e-5

    print("KERNEL_OK")
</pallas_src>

<mosaic_0001>
module attributes {stable_mosaic.version = 11 : i64} {
  func.func @_swish_kernel(%arg0: i32, %arg1: memref<16x128xf32, #tpu.memory_space<vmem>>, %arg2: memref<16x128xf32, #tpu.memory_space<vmem>>) attributes {dimension_semantics = [#tpu.dimension_semantics<parallel>], iteration_bounds = array<i64: 1>, scalar_prefetch = 0 : i64, scratch_operands = 0 : i64, tpu.core_type = #tpu.core_type<tc>, window_params = [{transform_indices = @transform_0, window_bounds = array<i64: 16, 128>}, {transform_indices = @transform_1, window_bounds = array<i64: 16, 128>}]} {
    %c0 = arith.constant 0 : index
    %c0_0 = arith.constant 0 : index
    %0 = vector.load %arg1[%c0, %c0_0] : memref<16x128xf32, #tpu.memory_space<vmem>>, vector<16x128xf32>
    %1 = arith.negf %0 : vector<16x128xf32>
    %2 = math.exp %1 : vector<16x128xf32>
    %cst = arith.constant 1.000000e+00 : f32
    %3 = vector.broadcast %cst : f32 to vector<16x128xf32>
    %4 = arith.addf %3, %2 : vector<16x128xf32>
    %5 = arith.divf %3, %4 : vector<16x128xf32>
    %6 = arith.mulf %0, %5 : vector<16x128xf32>
    %c0_1 = arith.constant 0 : index
    %c0_2 = arith.constant 0 : index
    %7 = vector.load %arg2[%c0_1, %c0_2] : memref<16x128xf32, #tpu.memory_space<vmem>>, vector<16x128xf32>
    tpu.vector_store %arg2[%c0_1, %c0_2], %6 {strides = array<i32>} : memref<16x128xf32, #tpu.memory_space<vmem>>, vector<16x128xf32>,
    return
  }
  func.func @transform_0(%arg0: i32) -> (i32, i32) {
    %c0_i32 = arith.constant 0 : i32
    %c0_i32_0 = arith.constant 0 : i32
    return %arg0, %c0_i32 : i32, i32
  }
  func.func @transform_1(%arg0: i32) -> (i32, i32) {
    %c0_i32 = arith.constant 0 : i32
    %c0_i32_0 = arith.constant 0 : i32
    return %arg0, %c0_i32 : i32, i32
  }
}

</mosaic_0001>

<bundles_post_ra>
// kernel: tpu_custom_call.1
= control target key start
LH: loop header
LB: loop body
LE: loop exit
PB: predicated region body
PF: predicated region fallthrough
CT: control target
= control target key end

     0   :  { %6 = vsyncpa [#allocation3], 0  ;;  %s164_s0 = inlined_call_operand.hbm [shape: f32[16,128], index: 0, kind: input, shape index: {}]   ;;  %s165_s1 = inlined_call_operand.hbm [shape: f32[16,128], index: 1, kind: output, shape index: {}]  }
   0x1   :  { %7 = vsyncpa [#allocation4], 0  ;;  %s120_s6 = smov [#allocation2]   ;;  %s72_s10 = scalar_lea.hbm %s164_s0, 256 }
   0x2   :  { %s13_s7 = sshll.u32 %s120_s6, 4  ;;  %p73_p0 = scmp.ne.s32.totalorder %s164_s0, %s72_s10  ;;  %s14_s7 = int_to_ptr.vmem [resolvable:$true] %s13_s7 }
   0x3   :  { %p76_p1 = scmp.lt.u32.totalorder %s72_s10, %s164_s0 }
   0x5   :  { %p78_p2 = pnand %p76_p1, %p73_p0 }
   0x7   :  { %81 = shalt.err (!%p78_p2)
}
   0x8   :  { %s82_s15 = scalar_lea.vmem %s14_s7, 256  ;;  %p87_p4 = scmp.lt.s32.totalorder %s14_s7, %s14_s7 }
   0x9   :  { %p83_p3 = scmp.ne.s32.totalorder %s14_s7, %s82_s15  ;;  %p88_p5 = scmp.lt.s32.totalorder %s82_s15, %s82_s15 }
   0xb   :  { %p89_p6 = por %p88_p5, %p87_p4 }
   0xd   :  { %p90_p7 = pnand %p89_p6, %p83_p3 }
   0xf   :  { %93 = shalt.err (!%p90_p7)
}
  0x10   :  { %s121_s16 = smov 128   ;;  %s122_s17 = smov 8  }
  0x11   :  { %19 = dma.hbm_to_vmem [thread:$0]  %s164_s0, 256, %s14_s7, [#allocation3], %s121_s16, %s121_s16, %s122_s17  }
  0x12   :  { %116 = dma.done.wait [#allocation3], 256  }
  0x13   :  { %117 = vsyncadd [#allocation3], 4294967040  ;;  %v23_v0 = vld [vmem:[#allocation2] sm:$0xff]  ;;  %v24_v1 = vld [vmem:[#allocation2 + $0x8] sm:$0xff]  ;;  %s123_s20 = smov [#allocation5]  }
  0x14   :  { %v58_v2 = vmul.f32 -1.442695, %v23_v0  ;;  %v59_v3 = vmul.f32 -1.442695, %v24_v1  ;;  %s46_s21 = sshll.u32 %s123_s20, 4  ;;  %s47_s21 = int_to_ptr.vmem [resolvable:$true] %s46_s21 }
  0x15   :  { %s94_s0 = scalar_lea.vmem %s47_s21, 256  ;;  %p99_p9 = scmp.lt.s32.totalorder %s47_s21, %s47_s21 }
  0x16   :  { %64 = vpow2.f32 %v58_v2  ;;  %p95_p8 = scmp.ne.s32.totalorder %s47_s21, %s94_s0  ;;  %p100_p10 = scmp.lt.s32.totalorder %s94_s0, %s94_s0 }
  0x17   :  { %66 = vpow2.f32 %v59_v3 }
  0x18   :  { %p101_p11 = por %p100_p10, %p99_p9 }
  0x1a   :  { %p102_p12 = pnand %p101_p11, %p95_p8 }
  0x20   :  { %v65_v4 = vpop.eup %64 }
  0x21   :  { %v67_v5 = vpop.eup %66  ;;  %v31_v6 = vadd.f32 1.0, %v65_v4 }
  0x22   :  { %v32_v7 = vadd.f32 1.0, %v67_v5 }
  0x23   :  { %68 = vrcp.f32 %v31_v6 }
  0x24   :  { %70 = vrcp.f32 %v32_v7 }
  0x2d   :  { %v69_v8 = vpop.eup %68 }
  0x2e   :  { %v71_v9 = vpop.eup %70  ;;  %v37_v10 = vmul.f32 %v69_v8, %v23_v0 }
  0x2f   :  { %v38_v11 = vmul.f32 %v71_v9, %v24_v1 }
  0x30   :  { %39 = vst [vmem:[#allocation5] sm:$0xff] %v37_v10 }
  0x31   :  { %40 = vst [vmem:[#allocation5 + $0x8] sm:$0xff] %v38_v11 }
  0x32   :  { %105 = shalt.err (!%p102_p12)
}
  0x33   :  { %s106_s24 = scalar_lea.hbm %s165_s1, 256 }
  0x34   :  { %p107_p13 = scmp.ne.s32.totalorder %s165_s1, %s106_s24  ;;  %p110_p0 = scmp.lt.u32.totalorder %s106_s24, %s165_s1 }
  0x36   :  { %p112_p1 = pnand %p110_p0, %p107_p13 }
  0x38   :  { %115 = shalt.err (!%p112_p1)
}
  0x39   :  { %52 = dma.vmem_to_hbm [thread:$0]  %s47_s21, 256, %s165_s1, [#allocation4], %s121_s16, %s121_s16, %s122_s17  }
  0x3a   :  { %118 = dma.done.wait [#allocation4], 256  }
  0x3b   :  { %119 = vsyncadd [#allocation4], 4294967040 }
  0x3c   :  { %56 = vsyncpa [#allocation3], 1 }
  0x3d   :  { %57 = vsyncpa [#allocation4], 1 }

</bundles_post_ra>
